<compile_context>
chip_gen: v7x
topology: tpu7x:2x2x1
jax: 0.10.0
libtpu: 0.0.40
codegen_flags: <defaults>
</compile_context>

<pallas_src>
import jax
import jax.numpy as jnp
from jax import lax
from jax.experimental import pallas as pl
from jax.experimental.pallas import tpu as pltpu


# ----------------------------------------------------------------------------- kernel

def _tokenizer_kernel(x_ref, w_ref, b_ref, o_ref):
    # x_ref: (Bn, C_in, TL) block of the NCW input (native dtype)
    # w_ref: (C_in, E_store) fused weight (x dtype), b_ref: (1, E_store) fused bias (f32)
    # o_ref: (Bn, TL, E_store) block of the (N, L, E_store) output
    w = w_ref[...]
    b = b_ref[...]
    for i in range(x_ref.shape[0]):            # static unroll over the batch block
        # Contract over C_in (dim 0 of the lhs tile). The (C_in, TL) tile is tiny
        # (C_in ~ few), so any lhs transpose Mosaic inserts lands on the XLU and
        # is free relative to the HBM-write-bound store below.
        y = lax.dot_general(
            x_ref[i], w,
            dimension_numbers=(((0,), (0,)), ((), ())),
            preferred_element_type=jnp.float32)            # (TL, E_store), f32 acc
        o_ref[i] = (y + b).astype(o_ref.dtype)


# ----------------------------------------------------------------------------- tiling

def _round_up(x, m):
    return ((x + m - 1) // m) * m


def _step_bytes(bn, tl, c_in, e_store, in_item, out_item):
    # Double-buffered x tile + out tile kept live by the auto-pipeline.
    return 2 * bn * tl * (c_in * in_item + e_store * out_item)


def _vmem_info():
    """(physical VMEM bytes, tile working-set budget), generation-aware."""
    try:
        cap = int(pltpu.get_tpu_info().vmem_capacity_bytes)
    except Exception:
        cap = 64 << 20          # fall back to the tightest case (v7x: 64 MiB / TC)
    # ~1/3 of physical VMEM for the double-buffered x/out tiles:
    #   v5e/v6e (128 MiB) -> ~42 MiB, v7x (64 MiB) -> ~21 MiB.
    # Leaves headroom for the resident fused weights + compiler scratch.
    return cap, max(16 << 20, cap // 3)


def _pick_tiles(N, L, c_in, e_store, in_item, out_item, budget, max_bn_unroll=8):
    """Pick (batch block Bn, token tile TL).

    TL: the largest 128-multiple divisor of L (candidates up to 16384) whose
    double-buffered footprint fits the budget; falls back to the full L for
    small/ragged L.  Bn: grows the batch block (static unroll, capped) when L is
    small, preferring >= 2 (and even) total grid steps for v7x megacore sharding.
    """
    tl_cands = [t for t in (16384, 8192, 4096, 2048, 1024, 512, 256, 128) if L % t == 0]
    if not tl_cands:
        tl_cands = [L]
    TL = next((t for t in tl_cands
               if _step_bytes(1, t, c_in, e_store, in_item, out_item) <= budget),
              tl_cands[-1])

    n_l = L // TL
    bn_cands = [b for b in range(min(N, max_bn_unroll), 0, -1) if N % b == 0]
    best, found_any = 1, False
    for b in bn_cands:
        if _step_bytes(b, TL, c_in, e_store, in_item, out_item) > budget:
            continue
        steps = (N // b) * n_l
        if steps >= 2:
            if not found_any:
                best, found_any = b, True
            if steps % 2 == 0:          # even step count -> both v7x TCs busy
                best = b
                break
    return best, TL


# ----------------------------------------------------------------------------- params

def conv1d_weight_to_matmul(w_oik):
    """PyTorch Conv1d weight (out, in, k=1) -> (in, out) matmul form."""
    return jnp.transpose(w_oik[..., 0], (1, 0))


def fuse_tokenizer_params(w1, b1, w2, b2, x_dtype=jnp.float32, lane_pad_max_ratio=0.125):
    """Fuse the two pointwise convs:  W = W1 @ W2,  b = b1 @ W2 + b2.

    Weights are in (in, out) matmul form (use conv1d_weight_to_matmul for real
    PyTorch checkpoints).  E is only padded to a 128 multiple when the pad is
    nearly free; otherwise the kernel writes the true E with masked stores.
    Returns (w_fused, b_fused, embed_dim).
    """
    w1f = w1.astype(jnp.float32)
    w2f = w2.astype(jnp.float32)
    w = jnp.dot(w1f, w2f)                                            # (C_in, E)
    b = jnp.dot(b1.astype(jnp.float32), w2f) + b2.astype(jnp.float32)

    e = int(w.shape[1])
    e_pad = _round_up(e, 128)
    if e_pad != e and (e_pad - e) <= lane_pad_max_ratio * e:
        w = jnp.pad(w, ((0, 0), (0, e_pad - e)))
        b = jnp.pad(b, ((0, e_pad - e),))

    w = w.astype(x_dtype)                     # MXU-native dtype, f32 accumulate
    b = b.reshape(1, -1).astype(jnp.float32)
    return w, b, e


# ----------------------------------------------------------------------------- wrapper

def conv_tokenizer_1d_fused(x_ncw, w_fused, b_fused, out_dim=None):
    """x_ncw: (N, C_in, L); returns (N, L, E) matching the PyTorch forward."""
    N, c_in, L = x_ncw.shape
    e_store = int(w_fused.shape[1])
    e = int(out_dim) if out_dim is not None else e_store

    in_item = jnp.dtype(x_ncw.dtype).itemsize
    out_item = in_item
    vmem_cap, budget = _vmem_info()

    L_work, pad_rows = L, 0
    bn, tl = _pick_tiles(N, L_work, c_in, e_store, in_item, out_item, budget)
    # Ragged huge L: one full-L tile could exceed physical VMEM -> pad L to a
    # 128 multiple so it can be tiled; padded rows are sliced off below.
    if _step_bytes(bn, tl, c_in, e_store, in_item, out_item) > vmem_cap - (8 << 20):
        L_work = _round_up(L, 128)
        pad_rows = L_work - L
        x_ncw = jnp.pad(x_ncw, ((0, 0), (0, 0), (0, pad_rows)))
        bn, tl = _pick_tiles(N, L_work, c_in, e_store, in_item, out_item, budget)

    # VMEM limit derived from the actually-chosen tiles (consistent with picker).
    vmem_need = (_step_bytes(bn, tl, c_in, e_store, in_item, out_item)
                 + 2 * (c_in + 1) * e_store * 4        # resident fused W + bias
                 + (2 << 20))                          # compiler scratch headroom
    vmem_limit = int(min(max(vmem_need, 16 << 20), vmem_cap))

    out = pl.pallas_call(
        _tokenizer_kernel,
        out_shape=jax.ShapeDtypeStruct((N, L_work, e_store), x_ncw.dtype),
        grid_spec=pltpu.PrefetchScalarGridSpec(
            num_scalar_prefetch=0,
            grid=(N // bn, L_work // tl),
            in_specs=[
                pl.BlockSpec((bn, c_in, tl), lambda n, l: (n, 0, l)),     # NCW block
                pl.BlockSpec((c_in, e_store), lambda n, l: (0, 0)),       # fused W
                pl.BlockSpec((1, e_store), lambda n, l: (0, 0)),          # fused b
            ],
            out_specs=pl.BlockSpec((bn, tl, e_store), lambda n, l: (n, l, 0)),
        ),
        compiler_params=pltpu.CompilerParams(
            dimension_semantics=("parallel", "parallel"),
            vmem_limit_bytes=vmem_limit),
    )(x_ncw, w_fused, b_fused)

    if pad_rows:
        out = out[:, :L, :]
    if e_store != e:
        out = out[:, :, :e]
    return out


def conv_tokenizer_1d(x_ncw, w1, b1, w2, b2):
    """Convenience wrapper: fuse per call (prefer fuse_tokenizer_params + _fused)."""
    w_fused, b_fused, e = fuse_tokenizer_params(w1, b1, w2, b2, x_ncw.dtype)
    return conv_tokenizer_1d_fused(x_ncw, w_fused, b_fused, out_dim=e)


# ----------------------------------------------------------------------------- test

def init_params(key, in_chans, embed_dim, dtype=jnp.float32):
    """Deterministic synthetic params in (in, out) matmul form."""
    h = embed_dim // 2
    k1, k2, k3, k4 = jax.random.split(key, 4)
    w1 = jax.random.normal(k1, (in_chans, h), dtype) * 0.1
    b1 = jax.random.normal(k2, (h,), dtype) * 0.1
    w2 = jax.random.normal(k3, (h, embed_dim), dtype) * 0.1
    b2 = jax.random.normal(k4, (embed_dim,), dtype) * 0.1
    return w1, b1, w2, b2


def reference(x_ncw, w1, b1, w2, b2):
    # Pure-JAX reference of the (unfused) PyTorch forward.
    x_tok = jnp.transpose(x_ncw, (0, 2, 1))                          # (N, L, C_in)
    h = jnp.einsum("nlc,ch->nlh", x_tok, w1) + b1
    return jnp.einsum("nlh,he->nle", h, w2) + b2                     # (N, L, E)


if __name__ == "__main__":
    key = jax.random.PRNGKey(0)
    kx, kp = jax.random.split(key)

    N, C_IN, L, EMBED = 2, 4, 16, 32
    x = jax.random.normal(kx, (N, C_IN, L), jnp.float32)
    w1, b1, w2, b2 = init_params(kp, C_IN, EMBED)

    # Fuse the two pointwise convs once, outside the per-call jitted path; the
    # fused weights are captured as constants in the jitted function.
    w_fused, b_fused, e_out = fuse_tokenizer_params(w1, b1, w2, b2, x.dtype)
    fn = jax.jit(lambda xx: conv_tokenizer_1d_fused(xx, w_fused, b_fused, out_dim=e_out))

    out = jax.block_until_ready(fn(x))

    ref = reference(x, w1, b1, w2, b2)
    assert out.shape == (N, L, EMBED), out.shape
    max_err = float(jnp.max(jnp.abs(out - ref)))
    assert jnp.allclose(out, ref, atol=1e-4, rtol=1e-4), max_err

    print("KERNEL_OK")
</pallas_src>

<mosaic_0001>
module attributes {stable_mosaic.version = 11 : i64} {
  func.func @_tokenizer_kernel(%arg0: i32, %arg1: i32, %arg2: memref<1x4x16xf32, #tpu.memory_space<vmem>>, %arg3: memref<4x32xf32, #tpu.memory_space<vmem>>, %arg4: memref<1x32xf32, #tpu.memory_space<vmem>>, %arg5: memref<1x16x32xf32, #tpu.memory_space<vmem>>) attributes {dimension_semantics = [#tpu.dimension_semantics<parallel>, #tpu.dimension_semantics<parallel>], iteration_bounds = array<i64: 2, 1>, scalar_prefetch = 0 : i64, scratch_operands = 0 : i64, tpu.core_type = #tpu.core_type<tc>, window_params = [{transform_indices = @transform_0, window_bounds = array<i64: 1, 4, 16>}, {pipeline_mode = #tpu.pipeline_mode<synchronous>, transform_indices = @transform_1, window_bounds = array<i64: 4, 32>}, {pipeline_mode = #tpu.pipeline_mode<synchronous>, transform_indices = @transform_2, window_bounds = array<i64: 1, 32>}, {transform_indices = @transform_3, window_bounds = array<i64: 1, 16, 32>}]} {
    %c0 = arith.constant 0 : index
    %c0_0 = arith.constant 0 : index
    %0 = vector.load %arg3[%c0, %c0_0] : memref<4x32xf32, #tpu.memory_space<vmem>>, vector<4x32xf32>
    %c0_1 = arith.constant 0 : index
    %c0_2 = arith.constant 0 : index
    %1 = vector.load %arg4[%c0_1, %c0_2] : memref<1x32xf32, #tpu.memory_space<vmem>>, vector<1x32xf32>
    %c0_3 = arith.constant 0 : index
    %c0_4 = arith.constant 0 : index
    %c0_5 = arith.constant 0 : index
    %2 = vector.load %arg2[%c0_3, %c0_4, %c0_5] : memref<1x4x16xf32, #tpu.memory_space<vmem>>, vector<1x4x16xf32>
    %3 = vector.shape_cast %2 : vector<1x4x16xf32> to vector<4x16xf32>
    %cst = arith.constant dense<0.000000e+00> : vector<16x32xf32>
    %4 = tpu.matmul %3, %0, %cst {dimension_numbers = #tpu.dot_dimension_numbers<[0], [0], [1], [1], [0, 1, 1, 1], [], []>} : vector<4x16xf32>, vector<4x32xf32>, vector<16x32xf32> -> vector<16x32xf32>
    %5 = vector.broadcast %1 : vector<1x32xf32> to vector<16x32xf32>
    %6 = arith.addf %4, %5 : vector<16x32xf32>
    %c0_6 = arith.constant 0 : index
    %c0_7 = arith.constant 0 : index
    %c0_8 = arith.constant 0 : index
    %7 = vector.load %arg5[%c0_6, %c0_7, %c0_8] : memref<1x16x32xf32, #tpu.memory_space<vmem>>, vector<1x16x32xf32>
    %8 = vector.shape_cast %7 : vector<1x16x32xf32> to vector<16x32xf32>
    %9 = vector.shape_cast %6 : vector<16x32xf32> to vector<1x16x32xf32>
    tpu.vector_store %arg5[%c0_6, %c0_7, %c0_8], %9 {strides = array<i32>} : memref<1x16x32xf32, #tpu.memory_space<vmem>>, vector<1x16x32xf32>,
    return
  }
  func.func @transform_0(%arg0: i32, %arg1: i32) -> (i32, i32, i32) {
    %c0_i32 = arith.constant 0 : i32
    %c0_i32_0 = arith.constant 0 : i32
    return %arg0, %c0_i32, %arg1 : i32, i32, i32
  }
  func.func @transform_1(%arg0: i32, %arg1: i32) -> (i32, i32) {
    %c0_i32 = arith.constant 0 : i32
    %c0_i32_0 = arith.constant 0 : i32
    %c0_i32_1 = arith.constant 0 : i32
    return %c0_i32, %c0_i32_0 : i32, i32
  }
  func.func @transform_2(%arg0: i32, %arg1: i32) -> (i32, i32) {
    %c0_i32 = arith.constant 0 : i32
    %c0_i32_0 = arith.constant 0 : i32
    %c0_i32_1 = arith.constant 0 : i32
    return %c0_i32, %c0_i32_0 : i32, i32
  }
  func.func @transform_3(%arg0: i32, %arg1: i32) -> (i32, i32, i32) {
    %c0_i32 = arith.constant 0 : i32
    %c0_i32_0 = arith.constant 0 : i32
    return %arg0, %arg1, %c0_i32 : i32, i32, i32
  }
}

</mosaic_0001>

<bundles_post_ra>
// kernel: _lambda_.1
= control target key start
LH: loop header
LB: loop body
LE: loop exit
PB: predicated region body
PF: predicated region fallthrough
CT: control target
= control target key end

     0   :  { %8 = vsyncpa [#allocation3], 0  ;;  %s956_s0 = inlined_call_operand.hbm [shape: f32[2,4,16], index: 0, kind: input, shape index: {}]   ;;  %s957_s1 = inlined_call_operand.hbm [shape: f32[4,32], index: 1, kind: input, shape index: {}]   ;;  %s958_s2 = inlined_call_operand.vmem [shape: f32[1,32], index: 2, kind: input, shape index: {}]   ;;  %s959_s3 = inlined_call_operand.hbm [shape: f32[2,16,32], index: 3, kind: output, shape index: {}]  }
   0x1   :  { %10 = vsyncpa [#allocation3 + $0x1], 0 }
   0x2   :  { %11 = vsyncpa [#allocation6], 0 }
   0x3   :  { %12 = vsyncpa [#allocation4], 0 }
   0x4   :  { %14 = vsyncpa [#allocation4 + $0x1], 0  ;;  %s734_s12 = smov 0   ;;  %s736_s13 = smov 0  }
   0x5   :  { %s738_s14 = smov 0   ;;  %s740_s15 = smov 0  }
   0x6   :  { %s742_s16 = smov 0   ;;  %s744_s17 = smov 0  }
   0x7 LB: > { %s458_s18 = sadd.s32 4294967295, %s707_s17   ;;  %s459_s19 = sadd.s32 4294967294, %s707_s17   ;;  %s707_s17 = sphi %s744_s17, %s20_s17   ;;  %s703_s16 = sphi %s742_s16, %s984_s16   ;;  %s699_s15 = sphi %s740_s15, %s983_s15   ;;  %s695_s14 = sphi %s738_s14, %s982_s14   ;;  %s691_s13 = sphi %s736_s13, %s981_s13   ;;  %s687_s12 = sphi %s734_s12, %s980_s12  }
   0x8   : > { %p54_p0 = scmp.ne.s32.totalorder %s691_s13, %s687_s12  ;;  %p768_p1 = scmp.eq.s32.totalorder %s458_s18, 0 }
   0x9   : > { %p772_p2 = scmp.eq.s32.totalorder %s458_s18, 1  ;;  %p128_p3 = scmp.eq.s32.totalorder %s459_s19, 1 }
   0xa   : > { %s964_s20 = scalar_select %p768_p1, 1, 0 }
   0xb   : > { %s965_s21 = scalar_select %p772_p2, 1, 0 }
   0xc   : > { %p778_p4 = por %p768_p1, %p54_p0  ;;  %p460_p5 = scmp.ge.s32.totalorder %s707_s17, 1 }
   0xd   : > { %p783_p6 = por %p128_p3, %p54_p0  ;;  %p135_p7 = scmp.lt.s32.totalorder %s707_s17, 3 }
   0xe   : > { %s966_s22 = scalar_select %p778_p4, 1, 0 }
   0xf   : > { %s967_s23 = scalar_select %p783_p6, 1, 0 }
  0x10   : > { %p788_p8 = pnand %p460_p5, %p135_p7  ;;  %s709_s25 = smov [#allocation5]  }
  0x11   : > { %s148_s26 = sshll.u32 %s709_s25, 4  ;;  %s32_s28 = sadd.s32 1, %s703_s16  ;;  %s149_s26 = int_to_ptr.vmem [resolvable:$true] %s148_s26 }
  0x12   : > { %s968_s24 = scalar_select %p788_p8, 1, 0 }
  0x13   : > { %p495_p10 = pneg %p788_p8  ;;  %s41_s29 = sadd.s32 1, %s695_s14 }
  0x14   : > { %p803_p12 = scmp.ge.s32.totalorder %s32_s28, 2  ;;  %s563_s6 = scalar_lea.hbm %s957_s1, 64 }
  0x15   : > { %p797_p11 = pnand %p495_p10, %p768_p1  ;;  %p564_p13 = scmp.ne.s32.totalorder %s957_s1, %s563_s6 }
  0x16   : > { %s970_s30 = scalar_select %p803_p12, 1, 0 }
  0x17   : > { %p565_p0 = pneg %p797_p11  ;;  %p570_p7 = scmp.lt.u32.totalorder %s563_s6, %s957_s1 }
  0x19   : > { %p566_p3 = pnand %p565_p0, %p564_p13 }
  0x1b   : > { %p567_p5 = pneg %p566_p3 }
  0x1d   : > { %p572_p10 = pnand %p570_p7, %p567_p5 }
  0x1f   : > { %575 = shalt.err (!%p572_p10)
}
  0x20   : > { %s576_s11 = scalar_lea.vmem %s149_s26, 64  ;;  %p584_p4 = scmp.lt.s32.totalorder %s149_s26, %s149_s26 }
  0x21   : > { %p577_p9 = scmp.ne.s32.totalorder %s149_s26, %s576_s11  ;;  %p585_p8 = scmp.lt.s32.totalorder %s576_s11, %s576_s11 }
  0x23   : > { %p579_p6 = pnand %p577_p9, %p565_p0  ;;  %p586_p2 = por %p585_p8, %p584_p4 }
  0x25   : > { %p580_p1 = pneg %p579_p6 }
  0x27   : > { %p587_p12 = pnand %p586_p2, %p580_p1 }
  0x29   : > { %590 = shalt.err (!%p587_p12)
}
  0x2a   : > { %498 = dma.hbm_to_vmem [thread:$0]  (!%p797_p11), %s957_s1, 64, %s149_s26, [#allocation6]  }
  0x2b   : > { %p971_p4 = scmp.ne.s32.totalorder %s970_s30, 0  ;;  %p48_p1 = scmp.ne.s32.totalorder %s695_s14, %s691_s13 }
  0x2c   : > { %p49_p2 = scmp.eq.s32.totalorder %s707_s17, 0  ;;  %p508_p6 = scmp.lt.s32.totalorder %s707_s17, 2 }
  0x2d   : > { %s986_s28 = smov (%p971_p4, %s32_s28), 0  ;;  %p972_p12 = scmp.ne.s32.totalorder %s965_s21, 0 }
  0x2e   : > { %s36_s25 = ssub.s32 %s703_s16, %s986_s28  ;;  %p50_p9 = por %p49_p2, %p48_p1 }
  0x2f   : > { %p39_p8 = scmp.eq.s32.totalorder %s36_s25, 0  ;;  %p835_p13 = por %p972_p12, %p48_p1 }
  0x30   : > { %s162_s4 = sand.u32 1, %s695_s14   ;;  %s464_s30 = sshll.u32 %s703_s16, 6 }
  0x31   : > { %s843_s5 = scalar_select %p39_p8, %s695_s14, %s41_s29  }
  0x32   : > { %s463_s26 = sshll.u32 %s162_s4, 2  ;;  %s849_s8 = scalar_lea.hbm %s956_s0, %s464_s30 }
  0x33   : > { %s166_s21 = scalar_lea.vmem [#allocation2], %s463_s26  ;;  %p853_p11 = pnand %p508_p6, %p50_p9 }
  0x34   : > { %s174_s9 = sshll.u32 %s166_s21, 4  ;;  %s163_s29 = scalar_lea.sflag [#allocation3], %s162_s4  ;;  %s851_s9 = int_to_ptr.vmem [resolvable:$true] %s174_s9 }
  0x35   : > { %s591_s11 = scalar_lea.hbm %s849_s8, 64  ;;  %p593_p3 = pneg %p853_p11 }
  0x36   : > { %p592_p0 = scmp.ne.s32.totalorder %s849_s8, %s591_s11  ;;  %s596_s25 = scalar_lea.hbm %s956_s0, 128 }
  0x37   : > { %p597_p10 = scmp.lt.u32.totalorder %s849_s8, %s956_s0  ;;  %p598_p4 = scmp.lt.u32.totalorder %s596_s25, %s591_s11 }
  0x38   : > { %p594_p5 = pnand %p593_p3, %p592_p0  ;;  %p600_p2 = scmp.lt.u32.totalorder %s591_s11, %s849_s8 }
  0x39   : > { %p599_p1 = por %p598_p4, %p597_p10 }
  0x3a   : > { %p595_p7 = pneg %p594_p5 }
  0x3b   : > { %p601_p6 = por %p600_p2, %p599_p1 }
  0x3d   : > { %p602_p8 = pnand %p601_p6, %p595_p7 }
  0x3f   : > { %605 = shalt.err (!%p602_p8)
}
  0x40   : > { %s606_s4 = scalar_lea.vmem %s851_s9, 64  ;;  %s710_s6 = smov [#allocation2]  }
  0x41   : > { %p607_p9 = scmp.ne.s32.totalorder %s851_s9, %s606_s4  ;;  %s611_s7 = sshll.u32 %s710_s6, 4  ;;  %s612_s7 = int_to_ptr.vmem [resolvable:$false] %s611_s7 }
  0x42   : > { %s613_s21 = scalar_lea.vmem %s612_s7, 128  ;;  %p614_p5 = scmp.lt.s32.totalorder %s851_s9, %s612_s7 }
  0x43   : > { %p609_p12 = pnand %p607_p9, %p593_p3  ;;  %p615_p10 = scmp.lt.s32.totalorder %s613_s21, %s606_s4 }
  0x45   : > { %p610_p0 = pneg %p609_p12  ;;  %p616_p4 = por %p615_p10, %p614_p5 }
  0x47   : > { %p617_p1 = pnand %p616_p4, %p610_p0 }
  0x49   : > { %620 = shalt.err (!%p617_p1)
}
  0x4a   : > { %502 = dma.hbm_to_vmem [thread:$0]  (!%p853_p11), %s849_s8, 64, %s851_s9, %s163_s29  }
  0x4b   : > { %p975_p7 = scmp.ne.s32.totalorder %s968_s24, 0 }
  0x4c   : > { %s885_s11 = sand.u32 (!%p975_p7), 1, %s691_s13   ;;  %p976_p3 = scmp.ne.s32.totalorder (!%p975_p7), %s966_s22, 0 }
  0x4d   : > { %183 = sbr.rel (%p975_p7) target bundleno = 452 (0x1c4), region = 32  ;;  %s466_s18 = sshll.u32 (!%p975_p7), %s885_s11, 2 }
  0x4e   : > { %s186_s19 = scalar_lea.sflag (!%p975_p7), [#allocation3], %s885_s11  ;;  %s189_s25 = scalar_lea.vmem (!%p975_p7), [#allocation2], %s466_s18 }
  0x54   : > { %674 = dma.done.wait (%p976_p3), %s186_s19, 64  }
  0x55   : > { %676 = vsyncadd (%p976_p3), %s186_s19, 4294967232  ;;  %p977_p2 = scmp.ne.s32.totalorder %s964_s20, 0 }
  0x57   : > { %678 = dma.done.wait (%p977_p2), [#allocation6], 64  }
  0x58   : > { %680 = vsyncadd (%p977_p2), [#allocation6], 4294967232  ;;  %v219_v0 = vld [vmem:[%s189_s25] sm:$0xf]  ;;  %v217_v1 = vld [vmem:[#allocation5] sm:$0xf] }
  0x59   : > { %226 = vxpose.xlu0.b32.start.end [1/1] (short) (narrow) %v219_v0, 16  ;;  %vm265_vm0 = vcmask 1043456   ;;  %vm258_vm1 = vcmask 31744   ;;  %s468_s22 = sshll.u32 %s885_s11, 4  ;;  %v469_v4 = vld [vmem:[%s958_s2] ss:$0 sm:$0xff] }
  0x5a   : > { %482 = vmatprep.subr.msk.mxu0 %vm265_vm0, %v217_v1  ;;  %s215_s24 = scalar_lea.vmem [#allocation7], %s468_s22  ;;  %s478_s10 = sshll.u32 %s699_s15, 8  ;;  %vm344_vm2 = vcmask 261120  }
  0x5b   : > { %483 = vmatpush3.msk.msra.mxu0 %vm265_vm0, %v217_v1  ;;  %s363_s8 = sshll.u32 %s215_s24, 4  ;;  %s907_s30 = scalar_lea.hbm %s959_s3, %s478_s10  ;;  %s902_s8 = int_to_ptr.vmem [resolvable:$true] %s363_s8 }
  0x5c   : > { %s348_s4 = scalar_lea.sflag [#allocation4], %s885_s11  ;;  %s621_s6 = scalar_lea.vmem %s902_s8, 256 }
  0x5d   : > { %p622_p11 = scmp.ne.s32.totalorder %s902_s8, %s621_s6  ;;  %s711_s15 = smov [#allocation7]  }
  0x5e   : > { %s625_s7 = sshll.u32 %s711_s15, 4  ;;  %s626_s7 = int_to_ptr.vmem [resolvable:$false] %s625_s7 }
  0x5f   : > { %p623_p6 = pnand %p622_p11, %p835_p13  ;;  %s627_s21 = scalar_lea.vmem %s626_s7, 512 }
  0x60   : > { %p628_p9 = scmp.lt.s32.totalorder %s902_s8, %s626_s7  ;;  %p629_p12 = scmp.lt.s32.totalorder %s627_s21, %s621_s6 }
  0x61   : > { %p624_p8 = pneg %p623_p6 }
  0x62   : > { %p630_p0 = por %p629_p12, %p628_p9 }
  0x64   : > { %p631_p5 = pnand %p630_p0, %p624_p8 }
  0xd9   : > { %v242_v2 = vpop.trf.xlu0 }
  0xda   : > { %484 = vmatprep.mubr.msk.f32.mxu0 %vm258_vm1, %v242_v2 }
  0xdd   : > { %v243_v3 = vpop.trf.xlu0 }
  0xde   : > { %485 = vmatmul.mubr.msk.f32.vlgmr.msra.gmra.mrb[0].mxu0 %vm258_vm1, %v243_v3 }
 0x1b1   : > { %v486_v5 = vpop.f32.mrb[0].mxu0 }
 0x1b2   : > { %v341_v6 = vadd.f32 %v486_v5, %v469_v4  ;;  %v335_v7 = vpop.f32.mrb[1].mxu0 }
 0x1b3   : > { %v336_v8 = vadd.f32 %v469_v4, %v335_v7 }
 0x1b4   : > { %346 = vst.msk [vmem:[%s215_s24 + $0x8] sm:$0xff] %vm344_vm2, %v341_v6 }
 0x1b5   : > { %345 = vst.msk [vmem:[%s215_s24] sm:$0xff] %vm344_vm2, %v336_v8 }
 0x1b6   : > { %634 = shalt.err (!%p631_p5)
}
 0x1b7   : > { %s635_s18 = scalar_lea.hbm %s907_s30, 256  ;;  %s639_s22 = scalar_lea.hbm %s959_s3, 512 }
 0x1b8   : > { %p636_p10 = scmp.ne.s32.totalorder %s907_s30, %s635_s18  ;;  %p640_p7 = scmp.lt.u32.totalorder %s907_s30, %s959_s3 }
 0x1b9   : > { %p641_p3 = scmp.lt.u32.totalorder %s639_s22, %s635_s18  ;;  %p643_p11 = scmp.lt.u32.totalorder %s635_s18, %s907_s30 }
 0x1ba   : > { %p637_p4 = pnand %p636_p10, %p835_p13 }
 0x1bb   : > { %p642_p2 = por %p641_p3, %p640_p7 }
 0x1bc   : > { %p638_p1 = pneg %p637_p4 }
 0x1bd   : > { %p644_p6 = por %p643_p11, %p642_p2 }
 0x1bf   : > { %p645_p8 = pnand %p644_p6, %p638_p1 }
 0x1c1   : > { %648 = shalt.err (!%p645_p8)
}
 0x1c2   : > { %s712_s9 = smov 128   ;;  %s713_s10 = smov 8  }
 0x1c3   : > { %493 = dma.vmem_to_hbm [thread:$0]  (%p835_p13), %s902_s8, 256, %s907_s30, %s348_s4, %s712_s9, %s712_s9, %s713_s10  }
 0x1c4 PF: > { %s378_s29 = sand.u32 1, %s687_s12   ;;  %p978_p9 = scmp.ne.s32.totalorder %s967_s23, 0 }
 0x1c5   : > { %p979_p12 = scmp.ge.s32.totalorder %s707_s17, 2  ;;  %s379_s26 = scalar_lea.sflag [#allocation4], %s378_s29 }
 0x1c7   : > { %p504_p0 = pnand %p979_p12, %p978_p9 }
 0x1c9   : > { %682 = dma.done.wait (!%p504_p0), %s379_s26, 256  }
 0x1ca   : > { %684 = vsyncadd (!%p504_p0), %s379_s26, 4294967040  ;;  %s20_s17 = sadd.s32 1, %s707_s17   ;;  %s980_s12 = smov %s691_s13 }
 0x1cb   : > { %p17_p5 = scmp.ge.s32.totalorder %s20_s17, 4   ;;  %s981_s13 = smov %s695_s14 }
 0x1cc   : > { %s982_s14 = smov %s843_s5  ;;  %s983_s15 = smov %s703_s16 }
 0x1cd   : > { %s984_s16 = smov %s986_s28  ;;  %19 = sbr.rel (!%p17_p5) target bundleno = 7 (0x7), region = 81 }
 0x1d4   :  { %384 = vsyncpa [#allocation3], 1 }
 0x1d5   :  { %386 = vsyncpa [#allocation3 + $0x1], 1 }
 0x1d6   :  { %387 = vsyncpa [#allocation6], 1 }
 0x1d7   :  { %388 = vsyncpa [#allocation4], 1 }
 0x1d8   :  { %390 = vsyncpa [#allocation4 + $0x1], 1 }

</bundles_post_ra>
